<compile_context>
chip_gen: v7x
topology: tpu7x:2x2x1
jax: 0.10.0
libtpu: 0.0.40
codegen_flags: <defaults>
</compile_context>

<pallas_src>
import numpy as np
import jax
import jax.numpy as jnp
from jax.experimental import pallas as pl
from jax.experimental.pallas import tpu as pltpu


# --------------------------------------------------------------------------------------
# Fused Pallas kernel: all layers in one invocation, A_stack and z stay in VMEM
# --------------------------------------------------------------------------------------

def _make_fused_kernel(num_rest, n_nodes):
    """Build the fused kernel for `num_rest` restPolarGateConv layers (Python-unrolled)."""

    def kernel(*refs):
        # ---- unpack refs: inputs..., out_ref ------------------------------------
        astk_ref, x_ref = refs[0], refs[1]
        w1p_ref, w1n_ref, w1s_ref, b1_ref = refs[2], refs[3], refs[4], refs[5]
        pos = 6
        rest_refs = [refs[pos + 4 * l: pos + 4 * l + 4] for l in range(num_rest)]
        pos += 4 * num_rest
        wf_ref, bf_ref = refs[pos], refs[pos + 1]
        out_ref = refs[pos + 2]

        N = n_nodes
        a = astk_ref[...]             # (2N, N) bf16, vertically stacked [A_pos; A_neg]
        x = x_ref[...]                # (N, in_dim) f32

        # ---- conv1 (first_aggr=True): ONE stacked aggregation + packed transforms
        # agg[:N] = A_pos @ x, agg[N:] = A_neg @ x  (bf16 operands, f32 accumulation)
        agg = jnp.dot(a, x.astype(jnp.bfloat16), preferred_element_type=jnp.float32)
        z = jnp.tanh(
            jnp.dot(agg[:N], w1p_ref[...], preferred_element_type=jnp.float32)
            + jnp.dot(agg[N:], w1n_ref[...], preferred_element_type=jnp.float32)
            + jnp.dot(x, w1s_ref[...], preferred_element_type=jnp.float32)
            + b1_ref[...])

        # ---- rest convs (first_aggr=False): one stacked aggregation + 3 packed dots
        for wa_ref, wb_ref, ws_ref, b_ref in rest_refs:
            agg = jnp.dot(a, z.astype(jnp.bfloat16),
                          preferred_element_type=jnp.float32)      # (2N, out_dim)
            z = jnp.tanh(
                jnp.dot(agg[:N], wa_ref[...], preferred_element_type=jnp.float32)
                + jnp.dot(agg[N:], wb_ref[...], preferred_element_type=jnp.float32)
                + jnp.dot(z, ws_ref[...], preferred_element_type=jnp.float32)
                + b_ref[...])

        # ---- z = tanh(self.weight(z)) : single lane-dense full-width store -------
        out_ref[...] = jnp.tanh(
            jnp.dot(z, wf_ref[...], preferred_element_type=jnp.float32) + bf_ref[...])

    return kernel


def _full_spec(a):
    nd = a.ndim
    # index_map works for gridless calls (zero args) and is robust to extra args.
    return pl.BlockSpec(a.shape, lambda *_, _nd=nd: (0,) * _nd)


# --------------------------------------------------------------------------------------
# Parameter init (PyTorch-Linear-like uniform) and wrapper-side one-time folding
# --------------------------------------------------------------------------------------

def _init_linear(key, in_dim, out_dim):
    kw, kb = jax.random.split(key)
    bound = 1.0 / np.sqrt(in_dim)
    w = jax.random.uniform(kw, (in_dim, out_dim), jnp.float32, -bound, bound)  # (in, out)
    b = jax.random.uniform(kb, (1, out_dim), jnp.float32, -bound, bound)
    return w, b


def init_polargate_params(key, in_dim, out_dim, layer_num):
    h = out_dim // 2
    keys = iter(jax.random.split(key, 64))
    params = {}
    # conv1 (first_aggr=True): four Linear layers  in_dim -> h
    params["conv1"] = tuple(_init_linear(next(keys), in_dim, h) for _ in range(4))
    # rest convs (first_aggr=False): lin_l are 2h -> h, lin_r are h -> h
    rest = []
    for _ in range(layer_num - 1):
        wpl, bpl = _init_linear(next(keys), 2 * h, h)
        wpr, bpr = _init_linear(next(keys), h, h)
        wnl, bnl = _init_linear(next(keys), 2 * h, h)
        wnr, bnr = _init_linear(next(keys), h, h)
        rest.append(((wpl, bpl), (wpr, bpr), (wnl, bnl), (wnr, bnr)))
    params["convs"] = rest
    # self.weight : Linear(out_dim, out_dim)
    params["weight"] = _init_linear(next(keys), out_dim, out_dim)
    return params


def _pack_params(params, in_dim, out_dim):
    """One-time fold of per-path weights/biases into full-width (lane-dense) matrices."""
    h = out_dim // 2
    zin = jnp.zeros((in_dim, h), jnp.float32)
    zhh = jnp.zeros((h, h), jnp.float32)

    (wpl, bpl), (wpr, bpr), (wnl, bnl), (wnr, bnr) = params["conv1"]
    w1p = jnp.concatenate([wpl, zin], axis=1)                 # agg_p -> pos half
    w1n = jnp.concatenate([zin, wnl], axis=1)                 # agg_n -> neg half
    w1s = jnp.concatenate([wpr, wnr], axis=1)                 # x skip -> both halves
    b1 = jnp.concatenate([bpl + bpr, bnl + bnr], axis=1)      # (1, out_dim)
    conv1_p = (w1p, w1n, w1s, b1)

    rest_p = []
    for (wpl, bpl), (wpr, bpr), (wnl, bnl), (wnr, bnr) in params["convs"]:
        # ap = A_pos @ z = [agg_pp | agg_pn] ; an = A_neg @ z = [agg_np | agg_nn]
        wa = jnp.concatenate([
            jnp.concatenate([wpl[:h, :], zhh], axis=1),       # agg_pp -> pos via wpl_top
            jnp.concatenate([zhh, wnl[:h, :]], axis=1),       # agg_pn -> neg via wnl_top
        ], axis=0)                                            # (out_dim, out_dim)
        wb = jnp.concatenate([
            jnp.concatenate([zhh, wnl[h:, :]], axis=1),       # agg_np -> neg via wnl_bot
            jnp.concatenate([wpl[h:, :], zhh], axis=1),       # agg_nn -> pos via wpl_bot
        ], axis=0)                                            # (out_dim, out_dim)
        ws = jnp.concatenate([
            jnp.concatenate([wpr, zhh], axis=1),
            jnp.concatenate([zhh, wnr], axis=1),
        ], axis=0)                                            # block-diag skip (out, out)
        b = jnp.concatenate([bpl + bpr, bnl + bnr], axis=1)   # (1, out_dim)
        rest_p.append((wa, wb, ws, b))

    final_p = params["weight"]                                # (out_dim, out_dim), (1, out_dim)
    return conv1_p, rest_p, final_p


# --------------------------------------------------------------------------------------
# Graph glue: edge split + dense row-mean-normalized adjacencies (stacked, bf16)
# --------------------------------------------------------------------------------------

def _split_edges(edge_index_s):
    """get_x_edge_index: rows with sign>0 / sign<0, first two cols, transposed."""
    e = np.asarray(edge_index_s)
    pos = e[e[:, 2] > 0][:, :2].T  # (2, E_pos): row0=src, row1=dst
    neg = e[e[:, 2] < 0][:, :2].T
    return pos, neg


def _dense_mean_adj(edge_index, n):
    """Row-mean-normalized dense adjacency: out[i] = mean_{j: j->i} x[j]."""
    A = np.zeros((n, n), np.float32)
    if edge_index.size:
        src, dst = edge_index[0], edge_index[1]
        np.add.at(A, (dst, src), 1.0)
    deg = np.maximum(A.sum(axis=1, keepdims=True), 1.0)
    return A / deg


def _stacked_adj_bf16(edge_index_s, n):
    pos_e, neg_e = _split_edges(edge_index_s)
    apos = _dense_mean_adj(pos_e, n)
    aneg = _dense_mean_adj(neg_e, n)
    # bf16 halves HBM traffic / VMEM residency of the only O(N^2) object; the MXU is
    # bf16-native on v5e/v6e/v7x.  f32 accumulation is preserved inside the kernel.
    return jnp.asarray(np.concatenate([apos, aneg], axis=0), jnp.bfloat16)   # (2N, N)


# --------------------------------------------------------------------------------------
# PolarGate forward: one fused pallas_call
# --------------------------------------------------------------------------------------

def _nbytes(a):
    return int(np.prod(a.shape)) * a.dtype.itemsize


def polargate_forward(params, init_emb, edge_index_s, node_num, out_dim):
    N = node_num
    a_stack = _stacked_adj_bf16(edge_index_s, N)               # (2N, N) bf16
    x = jnp.asarray(init_emb, jnp.float32)
    in_dim = x.shape[1]

    conv1_p, rest_p, final_p = _pack_params(params, in_dim, out_dim)
    num_rest = len(rest_p)

    args = [a_stack, x, *conv1_p]
    for layer in rest_p:
        args.extend(layer)
    args.extend(final_p)

    # ---- VMEM budget: everything (A_stack, weights, x, z, out) is resident --------
    in_bytes = sum(_nbytes(a) for a in args)
    out_bytes = N * out_dim * 4
    max_d = max(in_dim, out_dim)
    inter_bytes = 2 * (2 * N) * max_d * 4 + 6 * N * out_dim * 4   # agg + z temporaries
    needed = 2 * (in_bytes + out_bytes) + inter_bytes + (4 << 20)  # 2x: double buffering
    # TODO(synk): beyond this budget (and earlier on v7x, 64 MiB VMEM), switch to the
    #             row-tiled streamed-A variant described in the header instead of
    #             failing; at the toy sizes here we are orders of magnitude below it.
    if needed > (60 << 20):
        raise ValueError(
            f"PolarGate fused kernel needs ~{needed / 2**20:.1f} MiB of VMEM "
            "(resident A_stack regime exceeded); use a row-tiled streamed-A kernel.")
    vmem_limit = int(min(max(needed, 32 << 20), 60 << 20))

    # ---- cost estimate (scheduler hint) --------------------------------------------
    flops = 2 * (2 * N) * N * in_dim + 3 * 2 * N * in_dim * out_dim            # conv1
    flops += num_rest * (2 * (2 * N) * N * out_dim + 3 * 2 * N * out_dim * out_dim)
    flops += 2 * N * out_dim * out_dim                                          # final
    transcendentals = (num_rest + 2) * N * out_dim                              # tanh
    cost = pl.CostEstimate(flops=int(flops),
                           transcendentals=int(transcendentals),
                           bytes_accessed=int(in_bytes + out_bytes))

    kernel = _make_fused_kernel(num_rest, N)
    out = pl.pallas_call(
        kernel,
        out_shape=jax.ShapeDtypeStruct((N, out_dim), jnp.float32),
        in_specs=[_full_spec(a) for a in args],
        out_specs=pl.BlockSpec((N, out_dim), lambda *_: (0, 0)),
        compiler_params=pltpu.CompilerParams(vmem_limit_bytes=vmem_limit),
        cost_estimate=cost,
    )(*args)
    return out


# --------------------------------------------------------------------------------------
# Pure-JAX reference (original, unpacked f32 math) for correctness check
# --------------------------------------------------------------------------------------

def polargate_reference(params, init_emb, edge_index_s, node_num, out_dim):
    pos_e, neg_e = _split_edges(edge_index_s)
    apos = jnp.asarray(_dense_mean_adj(pos_e, node_num))
    aneg = jnp.asarray(_dense_mean_adj(neg_e, node_num))
    x = jnp.asarray(init_emb, jnp.float32)
    h = out_dim // 2

    (wpl, bpl), (wpr, bpr), (wnl, bnl), (wnr, bnr) = params["conv1"]
    out_pos = (apos @ x) @ wpl + bpl + x @ wpr + bpr
    out_neg = (aneg @ x) @ wnl + bnl + x @ wnr + bnr
    z = jnp.tanh(jnp.concatenate([out_pos, out_neg], axis=-1))

    for (wpl, bpl), (wpr, bpr), (wnl, bnl), (wnr, bnr) in params["convs"]:
        zp, zn = z[:, :h], z[:, h:]
        out_pos = (jnp.concatenate([apos @ zp, aneg @ zn], -1) @ wpl + bpl
                   + zp @ wpr + bpr)
        out_neg = (jnp.concatenate([apos @ zn, aneg @ zp], -1) @ wnl + bnl
                   + zn @ wnr + bnr)
        z = jnp.tanh(jnp.concatenate([out_pos, out_neg], axis=-1))

    w, b = params["weight"]
    return jnp.tanh(z @ w + b)


# --------------------------------------------------------------------------------------

if __name__ == "__main__":
    node_num = 16      # multiple of 8 -> sublane-aligned stacked-aggregation slices
    in_dim = 32
    out_dim = 32
    layer_num = 2
    num_edges = 48

    key = jax.random.PRNGKey(0)
    k_emb, k_src, k_dst, k_sgn, k_par = jax.random.split(key, 5)

    init_emb = jax.random.normal(k_emb, (node_num, in_dim), jnp.float32)

    src = jax.random.randint(k_src, (num_edges,), 0, node_num)
    dst = jax.random.randint(k_dst, (num_edges,), 0, node_num)
    sgn = jnp.where(jax.random.bernoulli(k_sgn, 0.5, (num_edges,)), 1, -1)
    # guarantee at least one positive and one negative edge
    sgn = sgn.at[0].set(1).at[1].set(-1)
    edge_index_s = jnp.stack([src, dst, sgn], axis=1).astype(jnp.int32)  # (E, 3)

    params = init_polargate_params(k_par, in_dim, out_dim, layer_num)

    z = polargate_forward(params, init_emb, edge_index_s, node_num, out_dim)
    z = jax.block_until_ready(z)

    z_ref = polargate_reference(params, init_emb, edge_index_s, node_num, out_dim)
    assert z.shape == (node_num, out_dim)
    # bf16 adjacencies/activations in the aggregation dots -> loosened tolerance
    np.testing.assert_allclose(np.asarray(z), np.asarray(z_ref), atol=2e-2, rtol=2e-2)

    print("KERNEL_OK")
</pallas_src>

<mosaic_0001>
module attributes {stable_mosaic.version = 11 : i64} {
  func.func @kernel(%arg0: memref<32x16xbf16, #tpu.memory_space<vmem>>, %arg1: memref<16x32xf32, #tpu.memory_space<vmem>>, %arg2: memref<32x32xf32, #tpu.memory_space<vmem>>, %arg3: memref<32x32xf32, #tpu.memory_space<vmem>>, %arg4: memref<32x32xf32, #tpu.memory_space<vmem>>, %arg5: memref<1x32xf32, #tpu.memory_space<vmem>>, %arg6: memref<32x32xf32, #tpu.memory_space<vmem>>, %arg7: memref<32x32xf32, #tpu.memory_space<vmem>>, %arg8: memref<32x32xf32, #tpu.memory_space<vmem>>, %arg9: memref<1x32xf32, #tpu.memory_space<vmem>>, %arg10: memref<32x32xf32, #tpu.memory_space<vmem>>, %arg11: memref<1x32xf32, #tpu.memory_space<vmem>>, %arg12: memref<16x32xf32, #tpu.memory_space<vmem>>) attributes {dimension_semantics = [], scalar_prefetch = 0 : i64, scratch_operands = 0 : i64, tpu.core_type = #tpu.core_type<tc>} {
    %c0 = arith.constant 0 : index
    %c0_0 = arith.constant 0 : index
    %0 = vector.load %arg0[%c0, %c0_0] : memref<32x16xbf16, #tpu.memory_space<vmem>>, vector<32x16xbf16>
    %c0_1 = arith.constant 0 : index
    %c0_2 = arith.constant 0 : index
    %1 = vector.load %arg1[%c0_1, %c0_2] : memref<16x32xf32, #tpu.memory_space<vmem>>, vector<16x32xf32>
    %2 = arith.truncf %1 : vector<16x32xf32> to vector<16x32xbf16>
    %cst = arith.constant dense<0.000000e+00> : vector<32x32xf32>
    %3 = tpu.matmul %0, %2, %cst {dimension_numbers = #tpu.dot_dimension_numbers<[1], [0], [0], [1], [0, 0, 1, 1], [], []>} : vector<32x16xbf16>, vector<16x32xbf16>, vector<32x32xf32> -> vector<32x32xf32>
    %4 = vector.extract_strided_slice %3 {offsets = [0, 0], sizes = [16, 32], strides = [1, 1]} : vector<32x32xf32> to vector<16x32xf32>
    %c0_3 = arith.constant 0 : index
    %c0_4 = arith.constant 0 : index
    %5 = vector.load %arg2[%c0_3, %c0_4] : memref<32x32xf32, #tpu.memory_space<vmem>>, vector<32x32xf32>
    %cst_5 = arith.constant dense<0.000000e+00> : vector<16x32xf32>
    %6 = tpu.matmul %4, %5, %cst_5 {dimension_numbers = #tpu.dot_dimension_numbers<[1], [0], [0], [1], [0, 0, 1, 1], [], []>} : vector<16x32xf32>, vector<32x32xf32>, vector<16x32xf32> -> vector<16x32xf32>
    %7 = vector.extract_strided_slice %3 {offsets = [16, 0], sizes = [16, 32], strides = [1, 1]} : vector<32x32xf32> to vector<16x32xf32>
    %c0_6 = arith.constant 0 : index
    %c0_7 = arith.constant 0 : index
    %8 = vector.load %arg3[%c0_6, %c0_7] : memref<32x32xf32, #tpu.memory_space<vmem>>, vector<32x32xf32>
    %cst_8 = arith.constant dense<0.000000e+00> : vector<16x32xf32>
    %9 = tpu.matmul %7, %8, %cst_8 {dimension_numbers = #tpu.dot_dimension_numbers<[1], [0], [0], [1], [0, 0, 1, 1], [], []>} : vector<16x32xf32>, vector<32x32xf32>, vector<16x32xf32> -> vector<16x32xf32>
    %10 = arith.addf %6, %9 : vector<16x32xf32>
    %c0_9 = arith.constant 0 : index
    %c0_10 = arith.constant 0 : index
    %11 = vector.load %arg4[%c0_9, %c0_10] : memref<32x32xf32, #tpu.memory_space<vmem>>, vector<32x32xf32>
    %cst_11 = arith.constant dense<0.000000e+00> : vector<16x32xf32>
    %12 = tpu.matmul %1, %11, %cst_11 {dimension_numbers = #tpu.dot_dimension_numbers<[1], [0], [0], [1], [0, 0, 1, 1], [], []>} : vector<16x32xf32>, vector<32x32xf32>, vector<16x32xf32> -> vector<16x32xf32>
    %13 = arith.addf %10, %12 : vector<16x32xf32>
    %c0_12 = arith.constant 0 : index
    %c0_13 = arith.constant 0 : index
    %14 = vector.load %arg5[%c0_12, %c0_13] : memref<1x32xf32, #tpu.memory_space<vmem>>, vector<1x32xf32>
    %15 = vector.broadcast %14 : vector<1x32xf32> to vector<16x32xf32>
    %16 = arith.addf %13, %15 : vector<16x32xf32>
    %17 = math.tanh %16 : vector<16x32xf32>
    %18 = arith.truncf %17 : vector<16x32xf32> to vector<16x32xbf16>
    %cst_14 = arith.constant dense<0.000000e+00> : vector<32x32xf32>
    %19 = tpu.matmul %0, %18, %cst_14 {dimension_numbers = #tpu.dot_dimension_numbers<[1], [0], [0], [1], [0, 0, 1, 1], [], []>} : vector<32x16xbf16>, vector<16x32xbf16>, vector<32x32xf32> -> vector<32x32xf32>
    %20 = vector.extract_strided_slice %19 {offsets = [0, 0], sizes = [16, 32], strides = [1, 1]} : vector<32x32xf32> to vector<16x32xf32>
    %c0_15 = arith.constant 0 : index
    %c0_16 = arith.constant 0 : index
    %21 = vector.load %arg6[%c0_15, %c0_16] : memref<32x32xf32, #tpu.memory_space<vmem>>, vector<32x32xf32>
    %cst_17 = arith.constant dense<0.000000e+00> : vector<16x32xf32>
    %22 = tpu.matmul %20, %21, %cst_17 {dimension_numbers = #tpu.dot_dimension_numbers<[1], [0], [0], [1], [0, 0, 1, 1], [], []>} : vector<16x32xf32>, vector<32x32xf32>, vector<16x32xf32> -> vector<16x32xf32>
    %23 = vector.extract_strided_slice %19 {offsets = [16, 0], sizes = [16, 32], strides = [1, 1]} : vector<32x32xf32> to vector<16x32xf32>
    %c0_18 = arith.constant 0 : index
    %c0_19 = arith.constant 0 : index
    %24 = vector.load %arg7[%c0_18, %c0_19] : memref<32x32xf32, #tpu.memory_space<vmem>>, vector<32x32xf32>
    %cst_20 = arith.constant dense<0.000000e+00> : vector<16x32xf32>
    %25 = tpu.matmul %23, %24, %cst_20 {dimension_numbers = #tpu.dot_dimension_numbers<[1], [0], [0], [1], [0, 0, 1, 1], [], []>} : vector<16x32xf32>, vector<32x32xf32>, vector<16x32xf32> -> vector<16x32xf32>
    %26 = arith.addf %22, %25 : vector<16x32xf32>
    %c0_21 = arith.constant 0 : index
    %c0_22 = arith.constant 0 : index
    %27 = vector.load %arg8[%c0_21, %c0_22] : memref<32x32xf32, #tpu.memory_space<vmem>>, vector<32x32xf32>
    %cst_23 = arith.constant dense<0.000000e+00> : vector<16x32xf32>
    %28 = tpu.matmul %17, %27, %cst_23 {dimension_numbers = #tpu.dot_dimension_numbers<[1], [0], [0], [1], [0, 0, 1, 1], [], []>} : vector<16x32xf32>, vector<32x32xf32>, vector<16x32xf32> -> vector<16x32xf32>
    %29 = arith.addf %26, %28 : vector<16x32xf32>
    %c0_24 = arith.constant 0 : index
    %c0_25 = arith.constant 0 : index
    %30 = vector.load %arg9[%c0_24, %c0_25] : memref<1x32xf32, #tpu.memory_space<vmem>>, vector<1x32xf32>
    %31 = vector.broadcast %30 : vector<1x32xf32> to vector<16x32xf32>
    %32 = arith.addf %29, %31 : vector<16x32xf32>
    %33 = math.tanh %32 : vector<16x32xf32>
    %c0_26 = arith.constant 0 : index
    %c0_27 = arith.constant 0 : index
    %34 = vector.load %arg10[%c0_26, %c0_27] : memref<32x32xf32, #tpu.memory_space<vmem>>, vector<32x32xf32>
    %cst_28 = arith.constant dense<0.000000e+00> : vector<16x32xf32>
    %35 = tpu.matmul %33, %34, %cst_28 {dimension_numbers = #tpu.dot_dimension_numbers<[1], [0], [0], [1], [0, 0, 1, 1], [], []>} : vector<16x32xf32>, vector<32x32xf32>, vector<16x32xf32> -> vector<16x32xf32>
    %c0_29 = arith.constant 0 : index
    %c0_30 = arith.constant 0 : index
    %36 = vector.load %arg11[%c0_29, %c0_30] : memref<1x32xf32, #tpu.memory_space<vmem>>, vector<1x32xf32>
    %37 = vector.broadcast %36 : vector<1x32xf32> to vector<16x32xf32>
    %38 = arith.addf %35, %37 : vector<16x32xf32>
    %39 = math.tanh %38 : vector<16x32xf32>
    %c0_31 = arith.constant 0 : index
    %c0_32 = arith.constant 0 : index
    %40 = vector.load %arg12[%c0_31, %c0_32] : memref<16x32xf32, #tpu.memory_space<vmem>>, vector<16x32xf32>
    tpu.vector_store %arg12[%c0_31, %c0_32], %39 {strides = array<i32>} : memref<16x32xf32, #tpu.memory_space<vmem>>, vector<16x32xf32>,
    return
  }
}

</mosaic_0001>

<bundles_post_ra>
// kernel: tpu_custom_call.1
= control target key start
LH: loop header
LB: loop body
LE: loop exit
PB: predicated region body
PF: predicated region fallthrough
CT: control target
= control target key end

     0   :  { %17 = vsyncpa [#allocation3], 0  ;;  %s1615_s0 = inlined_call_operand.vmem [shape: bf16[32,16], index: 0, kind: input, shape index: {}]   ;;  %s1616_s1 = inlined_call_operand.hbm [shape: f32[16,32], index: 1, kind: input, shape index: {}]   ;;  %s1617_s2 = inlined_call_operand.hbm [shape: f32[32,32], index: 2, kind: input, shape index: {}]   ;;  %s1618_s3 = inlined_call_operand.vmem [shape: f32[32,32], index: 3, kind: input, shape index: {}]   ;;  %s1619_s4 = inlined_call_operand.hbm [shape: f32[32,32], index: 4, kind: input, shape index: {}]   ;;  %s1620_s5 = inlined_call_operand.vmem [shape: f32[1,32], index: 5, kind: input, shape index: {}]   ;;  %s1621_s6 = inlined_call_operand.hbm [shape: f32[32,32], index: 6, kind: input, shape index: {}]   ;;  %s1622_s7 = inlined_call_operand.hbm [shape: f32[32,32], index: 7, kind: input, shape index: {}]   ;;  %s1623_s8 = inlined_call_operand.hbm [shape: f32[32,32], index: 8, kind: input, shape index: {}]   ;;  %s1624_s9 = inlined_call_operand.vmem [shape: f32[1,32], index: 9, kind: input, shape index: {}]   ;;  %s1625_s10 = inlined_call_operand.hbm [shape: f32[32,32], index: 10, kind: input, shape index: {}]   ;;  %s1626_s11 = inlined_call_operand.vmem [shape: f32[1,32], index: 11, kind: input, shape index: {}]   ;;  %s1627_s12 = inlined_call_operand.hbm [shape: f32[16,32], index: 12, kind: output, shape index: {}]  }
   0x1   :  { %18 = vsyncpa [#allocation6], 0 }
   0x2   :  { %19 = vsyncpa [#allocation9], 0 }
   0x3   :  { %20 = vsyncpa [#allocation12], 0 }
   0x4   :  { %21 = vsyncpa [#allocation4], 0  ;;  %s1348_s21 = smov [#allocation5]   ;;  %s1349_s23 = smov [#allocation8]  }
   0x5   :  { %s41_s22 = sshll.u32 %s1348_s21, 4  ;;  %s69_s24 = sshll.u32 %s1349_s23, 4  ;;  %s42_s22 = int_to_ptr.vmem [resolvable:$true] %s41_s22  ;;  %s1423_s24 = int_to_ptr.vmem [resolvable:$true] %s69_s24 }
   0x6   :  { %s1162_s27 = scalar_lea.hbm %s1617_s2, 512 }
   0x7   :  { %p1163_p0 = scmp.ne.s32.totalorder %s1617_s2, %s1162_s27  ;;  %p1166_p1 = scmp.lt.u32.totalorder %s1162_s27, %s1617_s2 }
   0x9   :  { %p1168_p2 = pnand %p1166_p1, %p1163_p0 }
   0xb   :  { %1171 = shalt.err (!%p1168_p2)
}
   0xc   :  { %s1172_s14 = scalar_lea.vmem %s42_s22, 512  ;;  %p1177_p4 = scmp.lt.s32.totalorder %s42_s22, %s42_s22 }
   0xd   :  { %p1173_p3 = scmp.ne.s32.totalorder %s42_s22, %s1172_s14  ;;  %p1178_p5 = scmp.lt.s32.totalorder %s1172_s14, %s1172_s14 }
   0xf   :  { %p1179_p6 = por %p1178_p5, %p1177_p4 }
  0x11   :  { %p1180_p7 = pnand %p1179_p6, %p1173_p3 }
  0x13   :  { %1183 = shalt.err (!%p1180_p7)
}
  0x14   :  { %s1350_s15 = smov 128   ;;  %s1351_s16 = smov 8  }
  0x15   :  { %47 = dma.hbm_to_vmem [thread:$0]  %s1617_s2, 512, %s42_s22, [#allocation6], %s1350_s15, %s1350_s15, %s1351_s16  }
  0x16   :  { %s1184_s21 = scalar_lea.hbm %s1621_s6, 512 }
  0x17   :  { %p1185_p8 = scmp.ne.s32.totalorder %s1621_s6, %s1184_s21  ;;  %p1188_p9 = scmp.lt.u32.totalorder %s1184_s21, %s1621_s6 }
  0x19   :  { %p1190_p10 = pnand %p1188_p9, %p1185_p8 }
  0x1b   :  { %1193 = shalt.err (!%p1190_p10)
}
  0x1c   :  { %s1194_s28 = scalar_lea.vmem %s1423_s24, 512  ;;  %p1199_p12 = scmp.lt.s32.totalorder %s1423_s24, %s1423_s24 }
  0x1d   :  { %p1195_p11 = scmp.ne.s32.totalorder %s1423_s24, %s1194_s28  ;;  %p1200_p13 = scmp.lt.s32.totalorder %s1194_s28, %s1194_s28 }
  0x1f   :  { %p1201_p0 = por %p1200_p13, %p1199_p12 }
  0x21   :  { %p1202_p1 = pnand %p1201_p0, %p1195_p11 }
  0x23   :  { %1205 = shalt.err (!%p1202_p1)
}
  0x24   :  { %75 = dma.hbm_to_vmem [thread:$0]  %s1621_s6, 512, %s1423_s24, [#allocation9], %s1350_s15, %s1350_s15, %s1351_s16  }
  0x25   :  { %s1352_s29 = smov [#allocation11]   ;;  %s1353_s13 = smov [#allocation2]  }
  0x26   :  { %s93_s30 = sshll.u32 %s1352_s29, 4  ;;  %s29_s14 = sshll.u32 %s1353_s13, 4  ;;  %s94_s30 = int_to_ptr.vmem [resolvable:$true] %s93_s30  ;;  %s1460_s14 = int_to_ptr.vmem [resolvable:$true] %s29_s14 }
  0x27   :  { %s1206_s19 = scalar_lea.hbm %s1623_s8, 512 }
  0x28   :  { %p1207_p2 = scmp.ne.s32.totalorder %s1623_s8, %s1206_s19  ;;  %p1210_p3 = scmp.lt.u32.totalorder %s1206_s19, %s1623_s8 }
  0x2a   :  { %p1212_p4 = pnand %p1210_p3, %p1207_p2 }
  0x2c   :  { %1215 = shalt.err (!%p1212_p4)
}
  0x2d   :  { %s1216_s6 = scalar_lea.vmem %s94_s30, 512  ;;  %p1221_p6 = scmp.lt.s32.totalorder %s94_s30, %s94_s30 }
  0x2e   :  { %p1217_p5 = scmp.ne.s32.totalorder %s94_s30, %s1216_s6  ;;  %p1222_p7 = scmp.lt.s32.totalorder %s1216_s6, %s1216_s6 }
  0x30   :  { %p1223_p8 = por %p1222_p7, %p1221_p6 }
  0x32   :  { %p1224_p9 = pnand %p1223_p8, %p1217_p5 }
  0x34   :  { %1227 = shalt.err (!%p1224_p9)
}
  0x35   :  { %99 = dma.hbm_to_vmem [thread:$0]  %s1623_s8, 512, %s94_s30, [#allocation12], %s1350_s15, %s1350_s15, %s1351_s16  }
  0x36   :  { %s1228_s2 = scalar_lea.hbm %s1616_s1, 256 }
  0x37   :  { %p1229_p10 = scmp.ne.s32.totalorder %s1616_s1, %s1228_s2  ;;  %p1232_p11 = scmp.lt.u32.totalorder %s1228_s2, %s1616_s1 }
  0x39   :  { %p1234_p12 = pnand %p1232_p11, %p1229_p10 }
  0x3b   :  { %1237 = shalt.err (!%p1234_p12)
}
  0x3c   :  { %s1238_s18 = scalar_lea.vmem %s1460_s14, 256  ;;  %p1243_p0 = scmp.lt.s32.totalorder %s1460_s14, %s1460_s14 }
  0x3d   :  { %p1239_p13 = scmp.ne.s32.totalorder %s1460_s14, %s1238_s18  ;;  %p1244_p1 = scmp.lt.s32.totalorder %s1238_s18, %s1238_s18 }
  0x3f   :  { %p1245_p2 = por %p1244_p1, %p1243_p0 }
  0x41   :  { %p1246_p3 = pnand %p1245_p2, %p1239_p13 }
  0x43   :  { %1249 = shalt.err (!%p1246_p3)
}
  0x44   :  { %35 = dma.hbm_to_vmem [thread:$0]  %s1616_s1, 256, %s1460_s14, [#allocation3], %s1350_s15, %s1350_s15, %s1351_s16  }
  0x45   :  { %s1354_s19 = smov [#allocation7]   ;;  %s1355_s21 = smov [#allocation10]  }
  0x46   :  { %s55_s20 = sshll.u32 %s1354_s19, 4  ;;  %s81_s23 = sshll.u32 %s1355_s21, 4  ;;  %s56_s20 = int_to_ptr.vmem [resolvable:$true] %s55_s20  ;;  %s1497_s23 = int_to_ptr.vmem [resolvable:$true] %s81_s23 }
  0x47   :  { %s1250_s24 = scalar_lea.hbm %s1619_s4, 512 }
  0x48   :  { %p1251_p4 = scmp.ne.s32.totalorder %s1619_s4, %s1250_s24  ;;  %p1254_p5 = scmp.lt.u32.totalorder %s1250_s24, %s1619_s4 }
  0x4a   :  { %p1256_p6 = pnand %p1254_p5, %p1251_p4 }
  0x4c   :  { %1259 = shalt.err (!%p1256_p6)
}
  0x4d   :  { %s1260_s1 = scalar_lea.vmem %s56_s20, 512  ;;  %p1265_p8 = scmp.lt.s32.totalorder %s56_s20, %s56_s20 }
  0x4e   :  { %p1261_p7 = scmp.ne.s32.totalorder %s56_s20, %s1260_s1  ;;  %p1266_p9 = scmp.lt.s32.totalorder %s1260_s1, %s1260_s1 }
  0x50   :  { %p1267_p10 = por %p1266_p9, %p1265_p8 }
  0x52   :  { %p1268_p11 = pnand %p1267_p10, %p1261_p7 }
  0x54   :  { %1271 = shalt.err (!%p1268_p11)
}
  0x55   :  { %61 = dma.hbm_to_vmem [thread:$0]  %s1619_s4, 512, %s56_s20, [#allocation6], %s1350_s15, %s1350_s15, %s1351_s16  }
  0x56   :  { %s1272_s17 = scalar_lea.hbm %s1622_s7, 512 }
  0x57   :  { %p1273_p12 = scmp.ne.s32.totalorder %s1622_s7, %s1272_s17  ;;  %p1276_p13 = scmp.lt.u32.totalorder %s1272_s17, %s1622_s7 }
  0x59   :  { %p1278_p0 = pnand %p1276_p13, %p1273_p12 }
  0x5b   :  { %1281 = shalt.err (!%p1278_p0)
}
  0x5c   :  { %s1282_s21 = scalar_lea.vmem %s1497_s23, 512  ;;  %p1287_p2 = scmp.lt.s32.totalorder %s1497_s23, %s1497_s23 }
  0x5d   :  { %p1283_p1 = scmp.ne.s32.totalorder %s1497_s23, %s1282_s21  ;;  %p1288_p3 = scmp.lt.s32.totalorder %s1282_s21, %s1282_s21 }
  0x5f   :  { %p1289_p4 = por %p1288_p3, %p1287_p2 }
  0x61   :  { %p1290_p5 = pnand %p1289_p4, %p1283_p1 }
  0x63   :  { %1293 = shalt.err (!%p1290_p5)
}
  0x64   :  { %87 = dma.hbm_to_vmem [thread:$0]  %s1622_s7, 512, %s1497_s23, [#allocation9], %s1350_s15, %s1350_s15, %s1351_s16  }
  0x65   :  { %s1356_s25 = smov [#allocation13]   ;;  %s1294_s27 = scalar_lea.hbm %s1625_s10, 512 }
  0x66   :  { %s107_s6 = sshll.u32 %s1356_s25, 4  ;;  %p1295_p6 = scmp.ne.s32.totalorder %s1625_s10, %s1294_s27  ;;  %s108_s6 = int_to_ptr.vmem [resolvable:$true] %s107_s6 }
  0x67   :  { %p1298_p7 = scmp.lt.u32.totalorder %s1294_s27, %s1625_s10 }
  0x69   :  { %p1300_p8 = pnand %p1298_p7, %p1295_p6 }
  0x6b   :  { %1303 = shalt.err (!%p1300_p8)
}
  0x6c   :  { %s1304_s22 = scalar_lea.vmem %s108_s6, 512  ;;  %p1309_p10 = scmp.lt.s32.totalorder %s108_s6, %s108_s6 }
  0x6d   :  { %p1305_p9 = scmp.ne.s32.totalorder %s108_s6, %s1304_s22  ;;  %p1310_p11 = scmp.lt.s32.totalorder %s1304_s22, %s1304_s22 }
  0x6f   :  { %p1311_p12 = por %p1310_p11, %p1309_p10 }
  0x71   :  { %p1312_p13 = pnand %p1311_p12, %p1305_p9 }
  0x73   :  { %1315 = shalt.err (!%p1312_p13)
}
  0x74   :  { %113 = dma.hbm_to_vmem [thread:$0]  %s1625_s10, 512, %s108_s6, [#allocation12], %s1350_s15, %s1350_s15, %s1351_s16  }
  0x75   :  { %1338 = dma.done.wait [#allocation3], 256  }
  0x76   :  { %1339 = vsyncadd [#allocation3], 4294967040 }
  0x77   :  { %1340 = dma.done.wait [#allocation6], 1024  }
  0x78   :  { %1341 = vsyncadd [#allocation6], 4294966272 }
  0x79   :  { %1342 = dma.done.wait [#allocation9], 1024  }
  0x7a   :  { %1343 = vsyncadd [#allocation9], 4294966272 }
  0x7b   :  { %1344 = dma.done.wait [#allocation12], 1024  }
  0x7c   :  { %1345 = vsyncadd [#allocation12], 4294966272  ;;  %v142_v0 = vld [vmem:[#allocation2] sm:$0xff]  ;;  %v143_v1 = vld [vmem:[#allocation2 + $0x8] sm:$0xff]  ;;  %vm155_vm0 = vcmask 130048   ;;  %vm219_vm1 = vcmask 261120  }
  0x7d   :  { %v144_v2 = vpack.c.bf16 %v143_v1, %v142_v0  ;;  %v1148_v3 = vld [vmem:[%s1615_s0] sm:$0xff]   ;;  %v1555_v4 = vld [vmem:[%s1615_s0 + $0x8] sm:$0xff]   ;;  %v217_v7 = vld [vmem:[%s1618_s3 + $0x10] sm:$0xff] }
  0x7e   :  { %v215_v5 = vld [vmem:[%s1618_s3] sm:$0xff]  ;;  %987 = vmatprep.mubr.msk.bf16.mxu0 %vm155_vm0, %v1148_v3  ;;  %v216_v6 = vld [vmem:[%s1618_s3 + $0x8] sm:$0xff]  ;;  %v218_v8 = vld [vmem:[%s1618_s3 + $0x18] sm:$0xff] }
  0x7f   :  { %985 = vmatprep.subr.bf16.mxu0 %v144_v2  ;;  %v1074_v9 = vpack.c.bf16 %v216_v6, %v215_v5  ;;  %v1078_v10 = vpack.c.bf16 %v218_v8, %v217_v7  ;;  %v211_v11 = vld [vmem:[#allocation5] sm:$0xff]  ;;  %v212_v12 = vld [vmem:[#allocation5 + $0x8] sm:$0xff]  ;;  %v213_v14 = vld [vmem:[#allocation5 + $0x10] sm:$0xff] }
  0x80   :  { %986 = vmatpush3.bf16.msra.mxu0 %v144_v2  ;;  %v1082_v13 = vpack.c.bf16 %v212_v12, %v211_v11  ;;  %v214_v15 = vld [vmem:[#allocation5 + $0x18] sm:$0xff]  ;;  %v382_v20 = vld [vmem:[#allocation7] sm:$0xff]  ;;  %v383_v21 = vld [vmem:[#allocation7 + $0x8] sm:$0xff] }
  0x81   :  { %1075 = vmatprep.subr.bf16.mxu1 %v1074_v9  ;;  %v1086_v18 = vpack.c.bf16 %v214_v15, %v213_v14  ;;  %v1090_v23 = vpack.c.bf16 %v383_v21, %v382_v20  ;;  %v384_v24 = vld [vmem:[#allocation7 + $0x10] sm:$0xff]  ;;  %v385_v25 = vld [vmem:[#allocation7 + $0x18] sm:$0xff]  ;;  %v924_v27 = vld [vmem:[%s1620_s5] ss:$0 sm:$0xff] }
  0x82   :  { %1077 = vmatpush3.bf16.msra.mxu1 %v1074_v9  ;;  %v1094_v26 = vpack.c.bf16 %v385_v25, %v384_v24  ;;  %v534_v32 = vld [vmem:[#allocation10] sm:$0xff]  ;;  %v535_v33 = vld [vmem:[#allocation10 + $0x8] sm:$0xff]  ;;  %v536_v38 = vld [vmem:[#allocation10 + $0x10] sm:$0xff] }
  0x83   :  { %988 = vmatmul.mubr.msk.bf16.vlgmr.msra.gmra.mrb[0].mxu0 %vm155_vm0, %v1555_v4  ;;  %1079 = vmatprep.subr.bf16.mxu1 %v1078_v10  ;;  %v1098_v37 = vpack.c.bf16 %v535_v33, %v534_v32  ;;  %v537_v39 = vld [vmem:[#allocation10 + $0x18] sm:$0xff]  ;;  %v530_v41 = vld [vmem:[#allocation8] sm:$0xff]  ;;  %v531_v42 = vld [vmem:[#allocation8 + $0x8] sm:$0xff] }
  0x84   :  { %1026 = vmatprep.mubr.msk.bf16.mxu0 %vm155_vm0, %v1148_v3  ;;  %v1102_v40 = vpack.c.bf16 %v537_v39, %v536_v38  ;;  %v1106_v43 = vpack.c.bf16 %v531_v42, %v530_v41  ;;  %v532_v44 = vld [vmem:[#allocation8 + $0x10] sm:$0xff]  ;;  %v533_v45 = vld [vmem:[#allocation8 + $0x18] sm:$0xff]  ;;  %v700_v50 = vld [vmem:[#allocation11] sm:$0xff] }
  0x85   :  { %v1110_v48 = vpack.c.bf16 %v533_v45, %v532_v44  ;;  %v701_v51 = vld [vmem:[#allocation11 + $0x8] sm:$0xff]  ;;  %v702_v54 = vld [vmem:[#allocation11 + $0x10] sm:$0xff]  ;;  %v703_v55 = vld [vmem:[#allocation11 + $0x18] sm:$0xff] }
  0x86   :  { %1081 = vmatpush3.bf16.msra.mxu1 %v1078_v10  ;;  %v1114_v53 = vpack.c.bf16 %v701_v51, %v700_v50  ;;  %v1118_v56 = vpack.c.bf16 %v703_v55, %v702_v54  ;;  %v798_v57 = vld [vmem:[#allocation13] sm:$0xff]  ;;  %v799_v58 = vld [vmem:[#allocation13 + $0x8] sm:$0xff]  ;;  %v800_v59 = vld [vmem:[#allocation13 + $0x10] sm:$0xff] }
  0x87   :  { %1083 = vmatprep.subr.bf16.mxu1 %v1082_v13  ;;  %v1122_v60 = vpack.c.bf16 %v799_v58, %v798_v57  ;;  %v801_v61 = vld [vmem:[#allocation13 + $0x18] sm:$0xff]  ;;  %v933_v63 = vld [vmem:[%s1624_s9] ss:$0 sm:$0xff]  ;;  %s1357_s9 = smov [#allocation14]  }
  0x88   :  { %v1126_v62 = vpack.c.bf16 %v801_v61, %v800_v59  ;;  %v934_v6 = vld [vmem:[%s1626_s11] ss:$0 sm:$0xff]  ;;  %s899_s27 = sshll.u32 %s1357_s9, 4  ;;  %s900_s27 = int_to_ptr.vmem [resolvable:$true] %s899_s27 }
  0x89   :  { %s1316_s28 = scalar_lea.vmem %s900_s27, 256  ;;  %p1321_p1 = scmp.lt.s32.totalorder %s900_s27, %s900_s27 }
  0x8a   :  { %p1317_p0 = scmp.ne.s32.totalorder %s900_s27, %s1316_s28  ;;  %p1322_p2 = scmp.lt.s32.totalorder %s1316_s28, %s1316_s28 }
  0x8c   :  { %p1323_p3 = por %p1322_p2, %p1321_p1 }
  0x8e   :  { %p1324_p4 = pnand %p1323_p3, %p1317_p0 }
 0x156   :  { %v989_v16 = vpop.f32.mrb[0].mxu0 }
 0x157   :  { %v196_v17 = vpop.f32.mrb[1].mxu0  ;;  %999 = vmatprep.mubr.msk.f32.mxu1 %vm219_vm1, %v989_v16 }
 0x158   :  { %v990_v19 = vpop.f32.mrb[2].mxu0 }
 0x159   :  { %v199_v22 = vpop.f32.mrb[3].mxu0  ;;  %1000 = vmatmul.mubr.msk.f32.vlgmr.msra.gmra.mrb[0].mxu1 %vm219_vm1, %v990_v19 }
 0x15a   :  { %1085 = vmatpush3.bf16.msra.mxu1 %v1082_v13  ;;  %1010 = vmatprep.mubr.msk.f32.mxu1 %vm219_vm1, %v196_v17 }
 0x15b   :  { %1087 = vmatprep.subr.bf16.mxu1 %v1086_v18 }
 0x15e   :  { %1089 = vmatpush3.bf16.msra.mxu1 %v1086_v18 }
 0x15f   :  { %1091 = vmatprep.subr.bf16.mxu1 %v1090_v23 }
 0x161   :  { %1011 = vmatmul.mubr.msk.f32.vlgmr.msra.gmra.mrb[0].mxu1 %vm219_vm1, %v199_v22 }
 0x162   :  { %1093 = vmatpush3.bf16.msra.mxu1 %v1090_v23  ;;  %1021 = vmatprep.mubr.msk.f32.mxu1 %vm219_vm1, %v142_v0 }
 0x163   :  { %1095 = vmatprep.subr.bf16.mxu1 %v1094_v26 }
 0x166   :  { %1097 = vmatpush3.bf16.msra.mxu1 %v1094_v26 }
 0x167   :  { %1123 = vmatprep.subr.bf16.mxu1 %v1122_v60 }
 0x169   :  { %1022 = vmatmul.mubr.msk.f32.vlgmr.msra.gmra.mrb[0].mxu1 %vm219_vm1, %v143_v1 }
 0x16a   :  { %1125 = vmatpush3.bf16.msra.mxu1 %v1122_v60 }
 0x16b   :  { %1127 = vmatprep.subr.bf16.mxu1 %v1126_v62 }
 0x16e   :  { %1129 = vmatpush3.bf16.msra.mxu1 %v1126_v62 }
 0x23c   :  { %v1023_v28 = vpop.f32.mrb[0].mxu1 }
 0x23d   :  { %v477_v29 = vadd.f32 %v1023_v28, %v924_v27  ;;  %v458_v30 = vpop.f32.mrb[1].mxu1 }
 0x23e   :  { %v476_v31 = vadd.f32 %v924_v27, %v458_v30 }
 0x23f   :  { %1150 = vtanh.f32 %v477_v29 }
 0x240   :  { %1152 = vtanh.f32 %v476_v31 }
 0x249   :  { %v1151_v34 = vpop.eup %1150 }
 0x24a   :  { %v1153_v35 = vpop.eup %1152 }
 0x24b   :  { %v480_v36 = vpack.c.bf16 %v1151_v34, %v1153_v35 }
 0x24d   :  { %1024 = vmatprep.subr.bf16.mxu0 %v480_v36 }
 0x24e   :  { %1025 = vmatpush3.bf16.msra.mxu0 %v480_v36 }
 0x24f   :  { %1099 = vmatprep.subr.bf16.mxu0 %v1098_v37 }
 0x251   :  { %1027 = vmatmul.mubr.msk.bf16.vlgmr.msra.gmra.mrb[4].mxu0 %vm155_vm0, %v1555_v4 }
 0x252   :  { %1101 = vmatpush3.bf16.msra.mxu0 %v1098_v37 }
 0x253   :  { %1103 = vmatprep.subr.bf16.mxu0 %v1102_v40 }
 0x256   :  { %1105 = vmatpush3.bf16.msra.mxu0 %v1102_v40 }
 0x257   :  { %1107 = vmatprep.subr.bf16.mxu0 %v1106_v43 }
 0x324   :  { %v1028_v46 = vpop.f32.mrb[4].mxu0 }
 0x325   :  { %v515_v47 = vpop.f32.mrb[5].mxu0  ;;  %1038 = vmatprep.mubr.msk.f32.mxu0 %vm219_vm1, %v1028_v46 }
 0x326   :  { %v1029_v49 = vpop.f32.mrb[6].mxu0 }
 0x327   :  { %1039 = vmatmul.mubr.msk.f32.vlgmr.msra.gmra.mrb[8].mxu0 %vm219_vm1, %v1029_v49  ;;  %v518_v52 = vpop.f32.mrb[7].mxu0 }
 0x328   :  { %1109 = vmatpush3.bf16.msra.mxu0 %v1106_v43  ;;  %1049 = vmatprep.mubr.msk.f32.mxu0 %vm219_vm1, %v515_v47 }
 0x329   :  { %1111 = vmatprep.subr.bf16.mxu0 %v1110_v48 }
 0x32c   :  { %1113 = vmatpush3.bf16.msra.mxu0 %v1110_v48 }
 0x32d   :  { %1115 = vmatprep.subr.bf16.mxu0 %v1114_v53 }
 0x32f   :  { %1050 = vmatmul.mubr.msk.f32.vlgmr.msra.gmra.mrb[8].mxu0 %vm219_vm1, %v518_v52 }
 0x330   :  { %1117 = vmatpush3.bf16.msra.mxu0 %v1114_v53  ;;  %1060 = vmatprep.mubr.msk.f32.mxu0 %vm219_vm1, %v1153_v35 }
 0x331   :  { %1119 = vmatprep.subr.bf16.mxu0 %v1118_v56 }
 0x334   :  { %1121 = vmatpush3.bf16.msra.mxu0 %v1118_v56 }
 0x337   :  { %1061 = vmatmul.mubr.msk.f32.vlgmr.msra.gmra.mrb[8].mxu0 %vm219_vm1, %v1151_v34 }
 0x40a   :  { %v1062_v0 = vpop.f32.mrb[8].mxu0 }
 0x40b   :  { %v795_v1 = vadd.f32 %v1062_v0, %v933_v63  ;;  %v776_v2 = vpop.f32.mrb[9].mxu0 }
 0x40c   :  { %v794_v3 = vadd.f32 %v933_v63, %v776_v2 }
 0x40e   :  { %1154 = vtanh.f32 %v794_v3 }
 0x40f   :  { %1156 = vtanh.f32 %v795_v1 }
 0x418   :  { %v1155_v4 = vpop.eup %1154 }
 0x419   :  { %v1157_v5 = vpop.eup %1156  ;;  %1071 = vmatprep.mubr.msk.f32.mxu1 %vm219_vm1, %v1155_v4 }
 0x41a   :  { %1072 = vmatmul.mubr.msk.f32.vlgmr.msra.gmra.mrb[2].mxu1 %vm219_vm1, %v1157_v5 }
 0x4ed   :  { %v1073_v7 = vpop.f32.mrb[2].mxu1 }
 0x4ee   :  { %v887_v8 = vadd.f32 %v1073_v7, %v934_v6  ;;  %v881_v9 = vpop.f32.mrb[3].mxu1 }
 0x4ef   :  { %v882_v10 = vadd.f32 %v934_v6, %v881_v9 }
 0x4f0   :  { %1158 = vtanh.f32 %v887_v8 }
 0x4f1   :  { %1160 = vtanh.f32 %v882_v10 }
 0x4fa   :  { %v1159_v11 = vpop.eup %1158 }
 0x4fb   :  { %v1161_v12 = vpop.eup %1160  ;;  %893 = vst.msk [vmem:[#allocation14 + $0x8] sm:$0xff] %vm219_vm1, %v1159_v11 }
 0x4fc   :  { %892 = vst.msk [vmem:[#allocation14] sm:$0xff] %vm219_vm1, %v1161_v12 }
 0x4fd   :  { %1327 = shalt.err (!%p1324_p4)
}
 0x4fe   :  { %s1328_s1 = scalar_lea.hbm %s1627_s12, 256 }
 0x4ff   :  { %p1329_p5 = scmp.ne.s32.totalorder %s1627_s12, %s1328_s1  ;;  %p1332_p6 = scmp.lt.u32.totalorder %s1328_s1, %s1627_s12 }
 0x501   :  { %p1334_p7 = pnand %p1332_p6, %p1329_p5 }
 0x503   :  { %1337 = shalt.err (!%p1334_p7)
}
 0x504   :  { %905 = dma.vmem_to_hbm [thread:$0]  %s900_s27, 256, %s1627_s12, [#allocation4], %s1350_s15, %s1350_s15, %s1351_s16  }
 0x505   :  { %1346 = dma.done.wait [#allocation4], 256  }
 0x506   :  { %1347 = vsyncadd [#allocation4], 4294967040 }
 0x507   :  { %909 = vsyncpa [#allocation3], 1 }
 0x508   :  { %910 = vsyncpa [#allocation6], 1 }
 0x509   :  { %911 = vsyncpa [#allocation9], 1 }
 0x50a   :  { %912 = vsyncpa [#allocation12], 1 }
 0x50b   :  { %913 = vsyncpa [#allocation4], 1 }

</bundles_post_ra>
